<compile_context>
chip_gen: v7x
topology: tpu7x:2x2x1
jax: 0.10.0
libtpu: 0.0.40
codegen_flags: <defaults>
</compile_context>

<pallas_src>
import numpy as np

import jax
import jax.numpy as jnp
from jax.experimental import pallas as pl
from jax.experimental.pallas import tpu as pltpu


def _pairwise_box_emb_kernel(c_ref, inv_freq_ref, phase_ref, o_ref):
    """One tile.

    c_ref:        (8, L) f32, rows = (fx1, fy1, fx2, fy2, sx1, sy1, sx2, sy2)
                  (xyxy corners of first/second box), boxes on the lane axis.
    inv_freq_ref: (d, 1) f32 per-channel inverse frequency (d = dim // 4).
    phase_ref:    (d, 1) f32 per-channel phase (0 -> sin slot, pi/2 -> cos slot).
    o_ref:        (4 * d, L) f32, embedding channels on the sublane axis.
    """
    c = c_ref[...]                       # (8, L)
    f4 = c[0:4]                          # first box corners  (4, L)
    s4 = c[4:8]                          # second box corners (4, L)

    mx = jnp.maximum(f4, s4)             # rows: max x1, max y1, max x2, max y2
    mn = jnp.minimum(f4, s4)             # rows: min x1, min y1, min x2, min y2

    iwh = jnp.maximum(mn[2:4] - mx[0:2], 0.0)    # intersection (w, h)      (2, L)
    uwh = mx[2:4] - mn[0:2]                      # enclosing union (w, h)   (2, L)
    whf = f4[2:4] - f4[0:2]                      # first box (w, h)         (2, L)
    whs = s4[2:4] - s4[0:2]                      # second box (w, h)        (2, L)
    dxy = ((f4[0:2] - s4[0:2]) + (f4[2:4] - s4[2:4])) * 0.5   # center dist (2, L)

    inter = iwh[0:1] * iwh[1:2]                               # (1, L)
    ua = uwh[0:1] * uwh[1:2]                                  # (1, L)
    areas = whf[0:1] * whf[1:2] + whs[0:1] * whs[1:2]         # (1, L)
    # Unguarded division matches the reference; padded lanes replicate a real
    # box pair so the denominator does not vanish there.
    iou = inter / (areas - inter)                             # (1, L)

    inv_freq = inv_freq_ref[...]         # (d, 1)
    phase = phase_ref[...]               # (d, 1)
    d = inv_freq.shape[0]

    # Channel j = ci*d + p: sin(coord_ci * inv_freq[p] + phase[p]); the phase
    # encodes the sin/cos interleave -> one transcendental per element.
    coords = (dxy[0:1], dxy[1:2], iou, ua)
    if d % 8 == 0:
        # (8,128)-tile-aligned sub-slice stores: each coordinate block retires
        # immediately as unmasked full-lane stores.
        for ci, coord in enumerate(coords):
            o_ref[ci * d:(ci + 1) * d, :] = (
                jnp.sin(coord * inv_freq + phase).astype(o_ref.dtype))
    else:
        blocks = [jnp.sin(coord * inv_freq + phase) for coord in coords]
        o_ref[...] = jnp.concatenate(blocks, axis=0).astype(o_ref.dtype)


def sinusoidal_pairwise_box_embeddings(first, second, *, dim: int = 32,
                                       temperature: int = 20,
                                       block_lanes: int = 32768):
    """first, second: [..., 4] float32 normalized-cxcywh boxes -> [..., dim]."""
    if dim % 4 != 0:
        raise ValueError(f"dim must be divisible by 4, got {dim}.")
    if first.shape != second.shape or first.shape[-1] != 4:
        raise ValueError("first/second must have matching [..., 4] shapes.")
    batch_shape = first.shape[:-1]
    d = dim // 4

    # Per-channel constants, passed to the kernel as tiny VMEM inputs.
    p = np.arange(d)
    inv_freq = jnp.asarray(
        float(temperature) ** (-(2.0 * (p // 2)) / float(d)),
        dtype=jnp.float32).reshape(d, 1)
    phase = jnp.asarray(
        np.where(p % 2 == 0, 0.0, np.pi / 2.0),
        dtype=jnp.float32).reshape(d, 1)

    f2 = first.reshape(-1, 4).astype(jnp.float32)
    s2 = second.reshape(-1, 4).astype(jnp.float32)
    n = f2.shape[0]

    # cxcywh -> xyxy corners, fused into one lane-dense (8, N) slab
    # (rows: first x1,y1,x2,y2 then second x1,y1,x2,y2).  Pure wrapper glue;
    # XLA fuses it with the transpose/pad pass below.
    def corners_t(b):                                      # (N, 4) -> (4, N)
        half = b[:, 2:4] * 0.5
        return jnp.concatenate([b[:, 0:2] - half, b[:, 0:2] + half], axis=-1).T

    coords8 = jnp.concatenate([corners_t(f2), corners_t(s2)], axis=0)  # (8, N)

    # Pad the lane axis to a multiple of 128 by replicating the last real box
    # pair (keeps padded columns finite; sliced off below).
    n_pad = ((n + 127) // 128) * 128
    if n_pad != n:
        coords8 = jnp.pad(coords8, ((0, 0), (0, n_pad - n)), mode="edge")

    # Tile selection: big tiles amortize the ~0.35 us/step overhead; keep >= 2
    # grid steps when there is enough work so the "parallel" axis can be
    # sharded across v7x's two TensorCores.  Default 32768 lanes is ~10 MiB
    # double-buffered for dim=32 (under v5e's 16 MiB scoped-VMEM default).
    block_lanes = max(128, (min(block_lanes, n_pad) // 128) * 128)
    if n_pad >= 256 and block_lanes >= n_pad:
        block_lanes = ((n_pad // 2 + 127) // 128) * 128

    grid = (pl.cdiv(n_pad, block_lanes),)
    vmem_bytes = 2 * (8 + dim) * block_lanes * 4      # double-buffered in+out

    out_t = pl.pallas_call(
        _pairwise_box_emb_kernel,
        out_shape=jax.ShapeDtypeStruct((dim, n_pad), jnp.float32),
        grid=grid,
        in_specs=[
            pl.BlockSpec((8, block_lanes), lambda i: (0, i)),
            pl.BlockSpec((d, 1), lambda i: (0, 0)),
            pl.BlockSpec((d, 1), lambda i: (0, 0)),
        ],
        out_specs=pl.BlockSpec((dim, block_lanes), lambda i: (0, i)),
        compiler_params=pltpu.CompilerParams(
            dimension_semantics=("parallel",),
            vmem_limit_bytes=min(max(vmem_bytes + (4 << 20), 32 << 20), 96 << 20),
        ),
    )(coords8, inv_freq, phase)

    # TODO(synk): consumers that can accept the (dim, N) channel-major layout
    # directly should skip this transpose (pure layout pass over the output).
    out = out_t[:, :n].T
    return out.reshape(*batch_shape, dim)


# ----------------------------- pure-JAX reference -----------------------------
def _ref_impl(first, second, dim, temperature):
    fcx, fcy, fw, fh = (first[..., k:k + 1] for k in range(4))
    scx, scy, sw, sh = (second[..., k:k + 1] for k in range(4))
    fx1, fy1, fx2, fy2 = fcx - fw / 2, fcy - fh / 2, fcx + fw / 2, fcy + fh / 2
    sx1, sy1, sx2, sy2 = scx - sw / 2, scy - sh / 2, scx + sw / 2, scy + sh / 2
    iw = jnp.clip(jnp.minimum(fx2, sx2) - jnp.maximum(fx1, sx1), 0.0)
    ih = jnp.clip(jnp.minimum(fy2, sy2) - jnp.maximum(fy1, sy1), 0.0)
    inter = iw * ih
    iou = inter / (fw * fh + sw * sh - inter)
    ua = (jnp.maximum(fx2, sx2) - jnp.minimum(fx1, sx1)) * \
         (jnp.maximum(fy2, sy2) - jnp.minimum(fy1, sy1))
    coords = jnp.concatenate([fcx - scx, fcy - scy, iou, ua], axis=-1)  # [..., 4]
    d = dim // 4
    dim_t = jnp.asarray(temperature, jnp.float32) ** (
        2.0 * (jnp.arange(d) // 2).astype(jnp.float32) / d)
    pos = coords[..., None] / dim_t                                     # [..., 4, d]
    pos = jnp.stack([jnp.sin(pos[..., 0::2]), jnp.cos(pos[..., 1::2])], axis=-1)
    return pos.reshape(*pos.shape[:-3], dim)


def _rand_boxes(key, shape):
    k1, k2 = jax.random.split(key)
    cxcy = jax.random.uniform(k1, (*shape, 2), minval=0.2, maxval=0.8)
    wh = jax.random.uniform(k2, (*shape, 2), minval=0.05, maxval=0.3)
    return jnp.concatenate([cxcy, wh], axis=-1).astype(jnp.float32)


if __name__ == "__main__":
    key = jax.random.PRNGKey(0)
    keys = jax.random.split(key, 6)
    D = 32

    # 1) Pairwise usage: B=2 batches, 8x8 box pairs -> leading shape (2, 8, 8).
    first = _rand_boxes(keys[0], (2, 8, 8))
    second = _rand_boxes(keys[1], (2, 8, 8))
    out = sinusoidal_pairwise_box_embeddings(first, second, dim=D, temperature=20)
    out = jax.block_until_ready(out)
    ref = _ref_impl(first, second, D, 20)
    assert out.shape == (2, 8, 8, D), out.shape
    assert jnp.allclose(out, ref, rtol=1e-5, atol=1e-5), \
        f"max err {jnp.max(jnp.abs(out - ref))}"

    # 2) N not a multiple of 128 exercises the edge-pad / slice path.
    f_odd = _rand_boxes(keys[2], (3, 5, 7))
    s_odd = _rand_boxes(keys[3], (3, 5, 7))
    out2 = sinusoidal_pairwise_box_embeddings(f_odd, s_odd, dim=D, temperature=20)
    out2 = jax.block_until_ready(out2)
    ref2 = _ref_impl(f_odd, s_odd, D, 20)
    assert out2.shape == (3, 5, 7, D), out2.shape
    assert jnp.allclose(out2, ref2, rtol=1e-5, atol=1e-5), \
        f"max err {jnp.max(jnp.abs(out2 - ref2))}"

    # 3) Larger N exercises a multi-step grid (>= 2 "parallel" steps).
    f_big = _rand_boxes(keys[4], (4, 32, 40))
    s_big = _rand_boxes(keys[5], (4, 32, 40))
    out3 = sinusoidal_pairwise_box_embeddings(f_big, s_big, dim=D, temperature=20)
    out3 = jax.block_until_ready(out3)
    ref3 = _ref_impl(f_big, s_big, D, 20)
    assert out3.shape == (4, 32, 40, D), out3.shape
    assert jnp.allclose(out3, ref3, rtol=1e-5, atol=1e-5), \
        f"max err {jnp.max(jnp.abs(out3 - ref3))}"

    print("KERNEL_OK")
</pallas_src>

<mosaic_0001>
module attributes {stable_mosaic.version = 11 : i64} {
  func.func @_pairwise_box_emb_kernel(%arg0: i32, %arg1: memref<8x128xf32, #tpu.memory_space<vmem>>, %arg2: memref<8x1xf32, #tpu.memory_space<vmem>>, %arg3: memref<8x1xf32, #tpu.memory_space<vmem>>, %arg4: memref<32x128xf32, #tpu.memory_space<vmem>>) attributes {dimension_semantics = [#tpu.dimension_semantics<parallel>], iteration_bounds = array<i64: 1>, scalar_prefetch = 0 : i64, scratch_operands = 0 : i64, tpu.core_type = #tpu.core_type<tc>, window_params = [{transform_indices = @transform_0, window_bounds = array<i64: 8, 128>}, {pipeline_mode = #tpu.pipeline_mode<synchronous>, transform_indices = @transform_1, window_bounds = array<i64: 8, 1>}, {pipeline_mode = #tpu.pipeline_mode<synchronous>, transform_indices = @transform_2, window_bounds = array<i64: 8, 1>}, {transform_indices = @transform_3, window_bounds = array<i64: 32, 128>}]} {
    %c0 = arith.constant 0 : index
    %c0_0 = arith.constant 0 : index
    %0 = vector.load %arg1[%c0, %c0_0] : memref<8x128xf32, #tpu.memory_space<vmem>>, vector<8x128xf32>
    %1 = vector.extract_strided_slice %0 {offsets = [0, 0], sizes = [4, 128], strides = [1, 1]} : vector<8x128xf32> to vector<4x128xf32>
    %2 = vector.extract_strided_slice %0 {offsets = [4, 0], sizes = [4, 128], strides = [1, 1]} : vector<8x128xf32> to vector<4x128xf32>
    %3 = arith.maximumf %1, %2 : vector<4x128xf32>
    %4 = arith.minimumf %1, %2 : vector<4x128xf32>
    %5 = vector.extract_strided_slice %4 {offsets = [2, 0], sizes = [2, 128], strides = [1, 1]} : vector<4x128xf32> to vector<2x128xf32>
    %6 = vector.extract_strided_slice %3 {offsets = [0, 0], sizes = [2, 128], strides = [1, 1]} : vector<4x128xf32> to vector<2x128xf32>
    %7 = arith.subf %5, %6 : vector<2x128xf32>
    %cst = arith.constant 0.000000e+00 : f32
    %8 = vector.broadcast %cst : f32 to vector<2x128xf32>
    %9 = arith.maximumf %7, %8 : vector<2x128xf32>
    %10 = vector.extract_strided_slice %3 {offsets = [2, 0], sizes = [2, 128], strides = [1, 1]} : vector<4x128xf32> to vector<2x128xf32>
    %11 = vector.extract_strided_slice %4 {offsets = [0, 0], sizes = [2, 128], strides = [1, 1]} : vector<4x128xf32> to vector<2x128xf32>
    %12 = arith.subf %10, %11 : vector<2x128xf32>
    %13 = vector.extract_strided_slice %1 {offsets = [2, 0], sizes = [2, 128], strides = [1, 1]} : vector<4x128xf32> to vector<2x128xf32>
    %14 = vector.extract_strided_slice %1 {offsets = [0, 0], sizes = [2, 128], strides = [1, 1]} : vector<4x128xf32> to vector<2x128xf32>
    %15 = arith.subf %13, %14 : vector<2x128xf32>
    %16 = vector.extract_strided_slice %2 {offsets = [2, 0], sizes = [2, 128], strides = [1, 1]} : vector<4x128xf32> to vector<2x128xf32>
    %17 = vector.extract_strided_slice %2 {offsets = [0, 0], sizes = [2, 128], strides = [1, 1]} : vector<4x128xf32> to vector<2x128xf32>
    %18 = arith.subf %16, %17 : vector<2x128xf32>
    %19 = vector.extract_strided_slice %1 {offsets = [0, 0], sizes = [2, 128], strides = [1, 1]} : vector<4x128xf32> to vector<2x128xf32>
    %20 = vector.extract_strided_slice %2 {offsets = [0, 0], sizes = [2, 128], strides = [1, 1]} : vector<4x128xf32> to vector<2x128xf32>
    %21 = arith.subf %19, %20 : vector<2x128xf32>
    %22 = vector.extract_strided_slice %1 {offsets = [2, 0], sizes = [2, 128], strides = [1, 1]} : vector<4x128xf32> to vector<2x128xf32>
    %23 = vector.extract_strided_slice %2 {offsets = [2, 0], sizes = [2, 128], strides = [1, 1]} : vector<4x128xf32> to vector<2x128xf32>
    %24 = arith.subf %22, %23 : vector<2x128xf32>
    %25 = arith.addf %21, %24 : vector<2x128xf32>
    %cst_1 = arith.constant 5.000000e-01 : f32
    %26 = vector.broadcast %cst_1 : f32 to vector<2x128xf32>
    %27 = arith.mulf %25, %26 : vector<2x128xf32>
    %28 = vector.extract_strided_slice %9 {offsets = [0, 0], sizes = [1, 128], strides = [1, 1]} : vector<2x128xf32> to vector<1x128xf32>
    %29 = vector.extract_strided_slice %9 {offsets = [1, 0], sizes = [1, 128], strides = [1, 1]} : vector<2x128xf32> to vector<1x128xf32>
    %30 = arith.mulf %28, %29 : vector<1x128xf32>
    %31 = vector.extract_strided_slice %12 {offsets = [0, 0], sizes = [1, 128], strides = [1, 1]} : vector<2x128xf32> to vector<1x128xf32>
    %32 = vector.extract_strided_slice %12 {offsets = [1, 0], sizes = [1, 128], strides = [1, 1]} : vector<2x128xf32> to vector<1x128xf32>
    %33 = arith.mulf %31, %32 : vector<1x128xf32>
    %34 = vector.extract_strided_slice %15 {offsets = [0, 0], sizes = [1, 128], strides = [1, 1]} : vector<2x128xf32> to vector<1x128xf32>
    %35 = vector.extract_strided_slice %15 {offsets = [1, 0], sizes = [1, 128], strides = [1, 1]} : vector<2x128xf32> to vector<1x128xf32>
    %36 = arith.mulf %34, %35 : vector<1x128xf32>
    %37 = vector.extract_strided_slice %18 {offsets = [0, 0], sizes = [1, 128], strides = [1, 1]} : vector<2x128xf32> to vector<1x128xf32>
    %38 = vector.extract_strided_slice %18 {offsets = [1, 0], sizes = [1, 128], strides = [1, 1]} : vector<2x128xf32> to vector<1x128xf32>
    %39 = arith.mulf %37, %38 : vector<1x128xf32>
    %40 = arith.addf %36, %39 : vector<1x128xf32>
    %41 = arith.subf %40, %30 : vector<1x128xf32>
    %42 = arith.divf %30, %41 : vector<1x128xf32>
    %c0_2 = arith.constant 0 : index
    %c0_3 = arith.constant 0 : index
    %43 = vector.load %arg2[%c0_2, %c0_3] : memref<8x1xf32, #tpu.memory_space<vmem>>, vector<8x1xf32>
    %c0_4 = arith.constant 0 : index
    %c0_5 = arith.constant 0 : index
    %44 = vector.load %arg3[%c0_4, %c0_5] : memref<8x1xf32, #tpu.memory_space<vmem>>, vector<8x1xf32>
    %45 = vector.extract_strided_slice %27 {offsets = [0, 0], sizes = [1, 128], strides = [1, 1]} : vector<2x128xf32> to vector<1x128xf32>
    %46 = vector.extract_strided_slice %27 {offsets = [1, 0], sizes = [1, 128], strides = [1, 1]} : vector<2x128xf32> to vector<1x128xf32>
    %47 = vector.broadcast %45 : vector<1x128xf32> to vector<8x128xf32>
    %48 = vector.broadcast %43 : vector<8x1xf32> to vector<8x128xf32>
    %49 = arith.mulf %47, %48 : vector<8x128xf32>
    %50 = vector.broadcast %44 : vector<8x1xf32> to vector<8x128xf32>
    %51 = arith.addf %49, %50 : vector<8x128xf32>
    %52 = math.sin %51 : vector<8x128xf32>
    %c0_6 = arith.constant 0 : index
    %c0_7 = arith.constant 0 : index
    %53 = vector.load %arg4[%c0_6, %c0_7] : memref<32x128xf32, #tpu.memory_space<vmem>>, vector<8x128xf32>
    tpu.vector_store %arg4[%c0_6, %c0_7], %52 {strides = array<i32>} : memref<32x128xf32, #tpu.memory_space<vmem>>, vector<8x128xf32>,
    %54 = vector.broadcast %46 : vector<1x128xf32> to vector<8x128xf32>
    %55 = vector.broadcast %43 : vector<8x1xf32> to vector<8x128xf32>
    %56 = arith.mulf %54, %55 : vector<8x128xf32>
    %57 = vector.broadcast %44 : vector<8x1xf32> to vector<8x128xf32>
    %58 = arith.addf %56, %57 : vector<8x128xf32>
    %59 = math.sin %58 : vector<8x128xf32>
    %c8 = arith.constant 8 : index
    %c0_8 = arith.constant 0 : index
    %60 = vector.load %arg4[%c8, %c0_8] : memref<32x128xf32, #tpu.memory_space<vmem>>, vector<8x128xf32>
    tpu.vector_store %arg4[%c8, %c0_8], %59 {strides = array<i32>} : memref<32x128xf32, #tpu.memory_space<vmem>>, vector<8x128xf32>,
    %61 = vector.broadcast %42 : vector<1x128xf32> to vector<8x128xf32>
    %62 = vector.broadcast %43 : vector<8x1xf32> to vector<8x128xf32>
    %63 = arith.mulf %61, %62 : vector<8x128xf32>
    %64 = vector.broadcast %44 : vector<8x1xf32> to vector<8x128xf32>
    %65 = arith.addf %63, %64 : vector<8x128xf32>
    %66 = math.sin %65 : vector<8x128xf32>
    %c16 = arith.constant 16 : index
    %c0_9 = arith.constant 0 : index
    %67 = vector.load %arg4[%c16, %c0_9] : memref<32x128xf32, #tpu.memory_space<vmem>>, vector<8x128xf32>
    tpu.vector_store %arg4[%c16, %c0_9], %66 {strides = array<i32>} : memref<32x128xf32, #tpu.memory_space<vmem>>, vector<8x128xf32>,
    %68 = vector.broadcast %33 : vector<1x128xf32> to vector<8x128xf32>
    %69 = vector.broadcast %43 : vector<8x1xf32> to vector<8x128xf32>
    %70 = arith.mulf %68, %69 : vector<8x128xf32>
    %71 = vector.broadcast %44 : vector<8x1xf32> to vector<8x128xf32>
    %72 = arith.addf %70, %71 : vector<8x128xf32>
    %73 = math.sin %72 : vector<8x128xf32>
    %c24 = arith.constant 24 : index
    %c0_10 = arith.constant 0 : index
    %74 = vector.load %arg4[%c24, %c0_10] : memref<32x128xf32, #tpu.memory_space<vmem>>, vector<8x128xf32>
    tpu.vector_store %arg4[%c24, %c0_10], %73 {strides = array<i32>} : memref<32x128xf32, #tpu.memory_space<vmem>>, vector<8x128xf32>,
    return
  }
  func.func @transform_0(%arg0: i32) -> (i32, i32) {
    %c0_i32 = arith.constant 0 : i32
    %c0_i32_0 = arith.constant 0 : i32
    return %c0_i32, %arg0 : i32, i32
  }
  func.func @transform_1(%arg0: i32) -> (i32, i32) {
    %c0_i32 = arith.constant 0 : i32
    %c0_i32_0 = arith.constant 0 : i32
    %c0_i32_1 = arith.constant 0 : i32
    return %c0_i32, %c0_i32_0 : i32, i32
  }
  func.func @transform_2(%arg0: i32) -> (i32, i32) {
    %c0_i32 = arith.constant 0 : i32
    %c0_i32_0 = arith.constant 0 : i32
    %c0_i32_1 = arith.constant 0 : i32
    return %c0_i32, %c0_i32_0 : i32, i32
  }
  func.func @transform_3(%arg0: i32) -> (i32, i32) {
    %c0_i32 = arith.constant 0 : i32
    %c0_i32_0 = arith.constant 0 : i32
    return %c0_i32, %arg0 : i32, i32
  }
}

</mosaic_0001>

<bundles_post_ra>
// kernel: tpu_custom_call.1
= control target key start
LH: loop header
LB: loop body
LE: loop exit
PB: predicated region body
PF: predicated region fallthrough
CT: control target
= control target key end

     0   :  { %s962_s0 = inlined_call_operand.vmem [shape: f32[8,128], index: 0, kind: input, shape index: {}]   ;;  %s963_s1 = inlined_call_operand.vmem [shape: f32[8,1], index: 1, kind: input, shape index: {}]   ;;  %s964_s2 = inlined_call_operand.vmem [shape: f32[8,1], index: 2, kind: input, shape index: {}]   ;;  %s965_s3 = inlined_call_operand.hbm [shape: f32[32,128], index: 3, kind: output, shape index: {}]  }
   0x1   :  { %v58_v0 = vld [vmem:[%s963_s1] sm:$0xff] }
   0x2   :  { %8 = vsyncpa [#allocation3], 0  ;;  %v615_v1 = vmov 0   ;;  %v59_v2 = vld [vmem:[%s964_s2] sm:$0xff]  ;;  %v60_v21 = vlaneseq }
   0x3   :  { %572 = vset.pattern.permute.xlu0 %v615_v1  ;;  %v15_v3 = vld [vmem:[%s962_s0] sm:$0xff]  ;;  %s622_s0 = smov [#allocation2]  }
   0x4   :  { %66 = vperm.xlu0 %572, %v58_v0   ;;  %v17_v4 = vrot.slane %v15_v3, 4  ;;  %v30_v6 = vrot.slane %v15_v3, 6  ;;  %v61_v23 = vshrl.u32 %v60_v21, 7  ;;  %v620_v21 = vmov 920167782   ;;  %s519_s1 = sshll.u32 %s622_s0, 4  ;;  %s520_s1 = int_to_ptr.vmem [resolvable:$true] %s519_s1 }
   0x5   :  { %s591_s2 = scalar_lea.vmem %s520_s1, 512  ;;  %p596_p1 = scmp.lt.s32.totalorder %s520_s1, %s520_s1 }
   0x6   :  { %v19_v5 = vmax.f32 %v15_v3, %v17_v4  ;;  %v20_v7 = vmin.f32 %v15_v3, %v17_v4  ;;  %v32_v9 = vsub.f32 %v15_v3, %v30_v6  ;;  %v33_v19 = vsub.f32 %v15_v3, %v17_v4  ;;  %p592_p0 = scmp.ne.s32.totalorder %s520_s1, %s591_s2  ;;  %p597_p2 = scmp.lt.s32.totalorder %s591_s2, %s591_s2 }
   0x7   :  { %v62_v27 = vsub.s32 0, %v61_v23  ;;  %v183_v28 = vsub.s32 1, %v61_v23  ;;  %v294_v30 = vsub.s32 2, %v61_v23 }
   0x8   :  { %72 = vperm.xlu0 %572, %v59_v2   ;;  %v22_v8 = vrot.slane %v19_v5, 6  ;;  %v48_v11 = vrot.slane %v32_v9, 1  ;;  %v35_v20 = vrot.slane %v33_v19, 2  ;;  %v27_v25 = vrot.slane %v20_v7, 6  ;;  %p598_p3 = por %p597_p2, %p596_p1 }
   0xa   :  { %v24_v10 = vsub.f32 %v20_v7, %v22_v8  ;;  %v50_v13 = vmul.f32 %v48_v11, %v32_v9  ;;  %v37_v22 = vadd.f32 %v35_v20, %v33_v19  ;;  %v29_v31 = vsub.f32 %v19_v5, %v27_v25  ;;  %p599_p4 = pnand %p598_p3, %p592_p0 }
   0xb   :  { %v616_v11 = vmov 683565275   ;;  %v619_v19 = vmov 2102212464  }
   0xc   :  { %v25_v12 = vmax.f32 %v24_v10, 0.0  ;;  %v52_v15 = vrot.slane %v50_v13, 4  ;;  %v38_v26 = vmul.f32 0.5, %v37_v22  ;;  %v44_v36 = vrot.slane %v29_v31, 1 }
   0xe   :  { %v40_v14 = vrot.slane %v25_v12, 1  ;;  %v54_v17 = vadd.f32 %v52_v15, %v50_v13  ;;  %v63_v32 = vrot.slane %v38_v26, %v62_v27  ;;  %v184_v33 = vrot.slane %v38_v26, %v183_v28 }
   0xf   :  { %v46_v44 = vmul.f32 %v44_v36, %v29_v31  ;;  %v617_v15 = vmov 2475754826   ;;  %v621_v28 = vmov 1326507024  }
  0x10   :  { %v42_v16 = vmul.f32 %v40_v14, %v25_v12 }
  0x11   :  { %v406_v55 = vrot.slane %v46_v44, %v294_v30 }
  0x12   :  { %v55_v18 = vsub.f32 %v54_v17, %v42_v16  ;;  %v618_v17 = vmov 2131351028  }
  0x14   :  { %573 = vrcp.f32 %v55_v18 }
  0x1e   :  { %v574_v24 = vpop.eup %573 }
  0x1f   :  { %v57_v29 = vmul.f32 %v574_v24, %v42_v16 }
  0x21   :  { %v295_v35 = vrot.slane %v57_v29, %v294_v30 }
  0x83   :  { %v67_v34 = vpop.permute.xlu0 %66 }
  0x84   :  { %v69_v37 = vmul.f32 %v67_v34, %v63_v32  ;;  %v185_v38 = vmul.f32 %v184_v33, %v67_v34  ;;  %v296_v40 = vmul.f32 %v295_v35, %v67_v34  ;;  %v407_v0 = vmul.f32 %v406_v55, %v67_v34 }
  0x87   :  { %v73_v39 = vpop.permute.xlu0 %72 }
  0x88   :  { %v654_v41 = vadd.f32 %v73_v39, %v69_v37  ;;  %v656_v42 = vadd.f32 %v185_v38, %v73_v39  ;;  %v658_v43 = vadd.f32 %v296_v40, %v73_v39  ;;  %v670_v5 = vadd.f32 %v407_v0, %v73_v39 }
  0x8a   :  { %v76_v45 = vand.u32 2147483647, %v654_v41  ;;  %v79_v46 = vand.u32 2139095040, %v654_v41  ;;  %v187_v47 = vand.u32 2147483647, %v656_v42  ;;  %v190_v48 = vand.u32 2139095040, %v656_v42 }
  0x8b   :  { %v301_v53 = vand.u32 2139095040, %v658_v43  ;;  %v298_v62 = vand.u32 2147483647, %v658_v43  ;;  %vm78_vm13 = vcmp.lt.s32.totalorder %v654_v41, 0 }
  0x8c   :  { %v80_v49 = vshrl.u32 %v79_v46, 23  ;;  %v83_v50 = vand.u32 8388607, %v76_v45  ;;  %v191_v51 = vshrl.u32 %v190_v48, 23  ;;  %v194_v52 = vand.u32 8388607, %v187_v47 }
  0x8d   :  { %v302_v57 = vshrl.u32 %v301_v53, 23  ;;  %v678_v8 = vand.u32 8388607, %v298_v62  ;;  %vm783_vm14 = vcmp.le.f32.partialorder %v76_v45, 0.7853982 }
  0x8e   :  { %v530_v54 = vadd.s32 4294967169, %v80_v49  ;;  %v534_v56 = vadd.s32 4294967169, %v191_v51  ;;  %v84_v58 = vor.u32 8388608, %v83_v50  ;;  %v195_v60 = vor.u32 8388608, %v194_v52 }
  0x8f   :  { %v538_v63 = vadd.s32 4294967169, %v302_v57 }
  0x90   :  { %v86_v59 = vadd.s32 1, %v530_v54  ;;  %v197_v61 = vadd.s32 1, %v534_v56  ;;  %v672_v6 = vshll.u32 %v84_v58, 8  ;;  %v674_v7 = vshll.u32 %v195_v60, 8 }
  0x91   :  { %v680_v9 = vadd.s32 1, %v538_v63 }
  0x92   :  { %vm87_vm0 = vcmp.gt.s32.totalorder %v86_v59, 0  ;;  %vm198_vm1 = vcmp.gt.s32.totalorder %v197_v61, 0 }
  0x93   :  { %v88_v1 = vsel %vm87_vm0, %v86_v59, 0  ;;  %v199_v4 = vsel %vm198_vm1, %v197_v61, 0  ;;  %vm309_vm6 = vcmp.gt.s32.totalorder %v680_v9, 0 }
  0x94   :  { %v89_v2 = vshrl.u32 %v88_v1, 5  ;;  %v90_v3 = vand.u32 31, %v88_v1  ;;  %v683_v13 = vshrl.u32 %v199_v4, 5  ;;  %v201_v14 = vand.u32 31, %v199_v4 }
  0x96   :  { %v91_v10 = vsub.s32 32, %v90_v3  ;;  %v93_v12 = vshll.u32 %v616_v11, %v90_v3  ;;  %v96_v16 = vshll.u32 %v617_v15, %v90_v3  ;;  %v99_v18 = vshll.u32 %v618_v17, %v90_v3 }
  0x97   :  { %v102_v20 = vshll.u32 %v619_v19, %v90_v3  ;;  %v105_v22 = vshll.u32 %v620_v21, %v90_v3  ;;  %vm108_vm2 = vcmp.lt.s32.totalorder %v89_v2, 1  ;;  %vm109_vm3 = vcmp.lt.s32.totalorder %v89_v2, 2 }
  0x98   :  { %v94_v23 = vshrl.u32 %v617_v15, %v91_v10  ;;  %v97_v24 = vshrl.u32 %v618_v17, %v91_v10  ;;  %v100_v25 = vshrl.u32 %v619_v19, %v91_v10  ;;  %v92_v26 = vshrl.u32 %v616_v11, %v91_v10 }
  0x99   :  { %v103_v27 = vshrl.u32 %v620_v21, %v91_v10  ;;  %v106_v29 = vshrl.u32 %v621_v28, %v91_v10  ;;  %v202_v33 = vsub.s32 32, %v201_v14  ;;  %vm110_vm4 = vcmp.lt.s32.totalorder %v89_v2, 3 }
  0x9a   :  { %v95_v30 = vor.u32 %v94_v23, %v93_v12  ;;  %v98_v31 = vor.u32 %v97_v24, %v96_v16  ;;  %v101_v32 = vor.u32 %v100_v25, %v99_v18  ;;  %vm111_vm5 = vcmp.lt.s32.totalorder %v89_v2, 4 }
  0x9b   :  { %v104_v34 = vor.u32 %v103_v27, %v102_v20  ;;  %v107_v35 = vor.u32 %v106_v29, %v105_v22  ;;  %v204_v48 = vshll.u32 %v616_v11, %v201_v14  ;;  %v205_v51 = vshrl.u32 %v617_v15, %v202_v33 }
  0x9c   :  { %v112_v36 = vsel %vm108_vm2, %v92_v26, %v95_v30  ;;  %v113_v37 = vsel %vm111_vm5, %v101_v32, 2102212464  ;;  %v116_v38 = vsel %vm108_vm2, %v95_v30, %v98_v31  ;;  %v120_v39 = vsel %vm108_vm2, %v98_v31, %v101_v32 }
  0x9d   :  { %v114_v40 = vsel %vm110_vm4, %v98_v31, %v113_v37  ;;  %v117_v44 = vsel %vm111_vm5, %v104_v34, 920167782  ;;  %v121_v46 = vsel %vm111_vm5, %v107_v35, 1326507024  ;;  %v207_v52 = vshll.u32 %v617_v15, %v201_v14 }
  0x9e   :  { %v118_v49 = vsel %vm110_vm4, %v101_v32, %v117_v44  ;;  %v122_v50 = vsel %vm110_vm4, %v104_v34, %v121_v46  ;;  %v115_v53 = vsel %vm109_vm3, %v112_v36, %v114_v40  ;;  %v208_v56 = vshrl.u32 %v618_v17, %v202_v33 }
  0x9f   :  { %v119_v54 = vsel %vm109_vm3, %v116_v38, %v118_v49  ;;  %v123_v55 = vsel %vm109_vm3, %v120_v39, %v122_v50  ;;  %v206_v61 = vor.u32 %v205_v51, %v204_v48  ;;  %v210_v0 = vshll.u32 %v618_v17, %v201_v14 }
  0xa0   :  { %v707_v57 = vmul.u32.u64.low %v672_v6, %v123_v55  ;;  %v708_v58 = vmul.u32.u64.high %v672_v6, %v123_v55, %v707_v57  ;;  %v711_v59 = vmul.u32.u64.low %v672_v6, %v119_v54  ;;  %v712_v60 = vmul.u32.u64.high %v672_v6, %v119_v54, %v711_v59 }
  0xa1   :  { %v209_v63 = vor.u32 %v208_v56, %v207_v52  ;;  %v211_v1 = vshrl.u32 %v619_v19, %v202_v33  ;;  %v203_v2 = vshrl.u32 %v616_v11, %v202_v33  ;;  %v213_v3 = vshll.u32 %v619_v19, %v201_v14 }
  0xa2   :  { %v214_v4 = vshrl.u32 %v620_v21, %v202_v33  ;;  %v217_v10 = vshrl.u32 %v621_v28, %v202_v33  ;;  %v131_v12 = vmul.u32 %v672_v6, %v115_v53  ;;  %v216_v18 = vshll.u32 %v620_v21, %v201_v14 }
  0xa3   :  { %v212_v16 = vor.u32 %v211_v1, %v210_v0  ;;  %vm219_vm7 = vcmp.lt.s32.totalorder %v683_v13, 1  ;;  %vm133_vm8 = vc.u32 %v708_v58, %v711_v59  ;;  %v134_v20 = vadd.s32 1, %v712_v60 }
  0xa4   :  { %v215_v22 = vor.u32 %v214_v4, %v213_v3  ;;  %vm220_vm9 = vcmp.lt.s32.totalorder %v683_v13, 2  ;;  %v218_v23 = vor.u32 %v217_v10, %v216_v18  ;;  %vm221_vm10 = vcmp.lt.s32.totalorder %v683_v13, 3 }
  0xa5   :  { %vm222_vm11 = vcmp.lt.s32.totalorder %v683_v13, 4  ;;  %v227_v24 = vsel %vm219_vm7, %v206_v61, %v209_v63  ;;  %v135_v6 = vsel %vm133_vm8, %v134_v20, %v712_v60  ;;  %v231_v26 = vsel %vm219_vm7, %v209_v63, %v212_v16 }
  0xa6   :  { %v224_v25 = vsel %vm222_vm11, %v212_v16, 2102212464  ;;  %v228_v14 = vsel %vm222_vm11, %v215_v22, 920167782  ;;  %v136_v27 = vadd.s32 %v135_v6, %v131_v12  ;;  %v223_v29 = vsel %vm219_vm7, %v203_v2, %v206_v61 }
  0xa7   :  { %v229_v30 = vsel %vm221_vm10, %v212_v16, %v228_v14  ;;  %v232_v31 = vsel %vm222_vm11, %v218_v23, 1326507024  ;;  %v225_v32 = vsel %vm221_vm10, %v209_v63, %v224_v25  ;;  %v310_v35 = vsel %vm309_vm6, %v680_v9, 0 }
  0xa8   :  { %v230_v33 = vsel %vm220_vm9, %v227_v24, %v229_v30  ;;  %v233_v34 = vsel %vm221_vm10, %v215_v22, %v232_v31  ;;  %v137_v36 = vadd.s32 536870912, %v136_v27  ;;  %v226_v48 = vsel %vm220_vm9, %v223_v29, %v225_v32 }
  0xa9   :  { %v234_v37 = vsel %vm220_vm9, %v231_v26, %v233_v34  ;;  %v739_v38 = vmul.u32.u64.low %v674_v7, %v230_v33  ;;  %v740_v39 = vmul.u32.u64.high %v674_v7, %v230_v33, %v739_v38  ;;  %v312_v49 = vand.u32 31, %v310_v35 }
  0xaa   :  { %v744_v40 = vmul.u32.u64.low %v674_v7, %v234_v37  ;;  %v745_v44 = vmul.u32.u64.high %v674_v7, %v234_v37, %v744_v40  ;;  %v138_v46 = vshrl.u32 %v137_v36, 30  ;;  %v306_v9 = vor.u32 8388608, %v678_v8 }
  0xab   :  { %v409_v50 = vand.u32 2147483647, %v670_v5  ;;  %v245_v52 = vadd.s32 1, %v740_v39  ;;  %v313_v53 = vsub.s32 32, %v312_v49  ;;  %v412_v54 = vand.u32 2139095040, %v670_v5 }
  0xac   :  { %v139_v51 = vshll.u32 %v138_v46, 30  ;;  %v242_v55 = vmul.u32 %v674_v7, %v226_v48  ;;  %vm244_vm12 = vc.u32 %v745_v44, %v739_v38  ;;  %v761_v60 = vshll.u32 %v306_v9, 8 }
  0xad   :  { %v246_v13 = vsel %vm244_vm12, %v245_v52, %v740_v39  ;;  %v316_v57 = vshrl.u32 %v617_v15, %v313_v53  ;;  %v765_v61 = vand.u32 8388607, %v409_v50  ;;  %v319_v63 = vshrl.u32 %v618_v17, %v313_v53 }
  0xae   :  { %v756_v56 = vsub.s32 %v136_v27, %v139_v51  ;;  %v247_v8 = vadd.s32 %v246_v13, %v242_v55  ;;  %v322_v0 = vshrl.u32 %v619_v19, %v313_v53  ;;  %v413_v1 = vshrl.u32 %v412_v54, 23 }
  0xaf   :  { %v162_v2 = vsub.s32 4, %v138_v46  ;;  %v770_v4 = vshrl.u32 %v310_v35, 5  ;;  %v315_v10 = vshll.u32 %v616_v11, %v312_v49  ;;  %v318_v16 = vshll.u32 %v617_v15, %v312_v49 }
  0xb0   :  { %v142_v7 = vsub.s32 0, %v756_v56  ;;  %v248_v3 = vadd.s32 536870912, %v247_v8  ;;  %v321_v18 = vshll.u32 %v618_v17, %v312_v49  ;;  %v325_v20 = vshrl.u32 %v620_v21, %v313_v53 }
  0xb1   :  { %v317_v23 = vor.u32 %v316_v57, %v315_v10  ;;  %v324_v24 = vshll.u32 %v619_v19, %v312_v49  ;;  %v328_v6 = vshrl.u32 %v621_v28, %v313_v53  ;;  %v320_v26 = vor.u32 %v319_v63, %v318_v16 }
  0xb2   :  { %v531_v12 = vmin.u32 %v142_v7, %v756_v56  ;;  %v777_v22 = vshrl.u32 %v248_v3, 30  ;;  %v323_v27 = vor.u32 %v322_v0, %v321_v18  ;;  %v327_v29 = vshll.u32 %v620_v21, %v312_v49 }
  0xb3   :  { %v132_v30 = vadd.s32 %v711_v59, %v708_v58  ;;  %v326_v32 = vor.u32 %v325_v20, %v324_v24  ;;  %v542_v33 = vadd.s32 4294967169, %v413_v1  ;;  %vm330_vm15 = vcmp.lt.s32.totalorder %v770_v4, 1 }
  0xb4   :  { %v144_v14 = vclz %v531_v12  ;;  %v250_v31 = vshll.u32 %v777_v22, 30  ;;  %v329_v35 = vor.u32 %v328_v6, %v327_v29  ;;  %vm333_vm0 = vcmp.lt.s32.totalorder %v770_v4, 4 }
  0xb5   :  { %vm331_vm1 = vcmp.lt.s32.totalorder %v770_v4, 2  ;;  %vm332_vm2 = vcmp.lt.s32.totalorder %v770_v4, 3  ;;  %v339_v36 = vsel %vm333_vm0, %v326_v32, 920167782  ;;  %v163_v58 = vsel %vm78_vm13, %v162_v2, %v138_v46 }
  0xb6   :  { %v532_v34 = vadd.s32 4294967294, %v144_v14  ;;  %v793_v45 = vsub.s32 %v247_v8, %v250_v31  ;;  %v338_v59 = vsel %vm330_vm15, %v317_v23, %v320_v26  ;;  %v340_v37 = vsel %vm332_vm2, %v323_v27, %v339_v36 }
  0xb7   :  { %v314_v48 = vshrl.u32 %v616_v11, %v313_v53  ;;  %v342_v49 = vsel %vm330_vm15, %v320_v26, %v323_v27  ;;  %v335_v52 = vsel %vm333_vm0, %v323_v27, 2102212464  ;;  %v343_v46 = vsel %vm333_vm0, %v329_v35, 1326507024 }
  0xb8   :  { %vm533_vm3 = vcmp.lt.s32.totalorder %v532_v34, 0  ;;  %v253_v40 = vsub.s32 0, %v793_v45  ;;  %v341_v13 = vsel %vm331_vm1, %v338_v59, %v340_v37  ;;  %v344_v53 = vsel %vm332_vm2, %v326_v32, %v343_v46 }
  0xb9   :  { %v147_v39 = vsel %vm533_vm3, 0, %v532_v34  ;;  %v345_v7 = vsel %vm331_vm1, %v342_v49, %v344_v53  ;;  %v419_v63 = vadd.s32 1, %v542_v33  ;;  %v165_v0 = vsel %vm783_vm14, 0, %v163_v58 }
  0xba   :  { %v148_v9 = vsub.s32 32, %v147_v39  ;;  %v152_v51 = vsub.s32 4294967266, %v147_v39  ;;  %v149_v54 = vshll.u32 %v756_v56, %v147_v39  ;;  %v535_v55 = vmin.u32 %v253_v40, %v793_v45 }
  0xbb   :  { %v334_v56 = vsel %vm330_vm15, %v314_v48, %v317_v23  ;;  %v336_v2 = vsel %vm332_vm2, %v320_v26, %v335_v52  ;;  %v828_v12 = vmul.u32.u64.low %v761_v60, %v345_v7  ;;  %v829_v16 = vmul.u32.u64.high %v761_v60, %v345_v7, %v828_v12 }
  0xbc   :  { %v150_v8 = vshrl.u32 %v132_v30, %v148_v9  ;;  %v153_v57 = vadd.s32 127, %v152_v51  ;;  %v255_v1 = vclz %v535_v55  ;;  %vm420_vm4 = vcmp.gt.s32.totalorder %v419_v63, 0 }
  0xbd   :  { %v832_v20 = vmul.u32.u64.low %v761_v60, %v341_v13  ;;  %v833_v24 = vmul.u32.u64.high %v761_v60, %v341_v13, %v832_v20  ;;  %v243_v23 = vadd.s32 %v739_v38, %v745_v44  ;;  %v417_v14 = vor.u32 8388608, %v765_v61 }
  0xbe   :  { %v151_v3 = vor.u32 %v150_v8, %v149_v54  ;;  %v154_v10 = vshll.u32 %v153_v57, 23  ;;  %v536_v18 = vadd.s32 4294967294, %v255_v1  ;;  %v421_v26 = vsel %vm420_vm4, %v419_v63, 0 }
  0xbf   :  { %v169_v27 = vadd.s32 3, %v165_v0  ;;  %v337_v29 = vsel %vm331_vm1, %v334_v56, %v336_v2  ;;  %v423_v30 = vand.u32 31, %v421_v26  ;;  %vm355_vm6 = vc.u32 %v829_v16, %v832_v20 }
  0xc0   :  { %v155_v6 = vor.u32 4788187, %v154_v10  ;;  %vm537_vm5 = vcmp.lt.s32.totalorder %v536_v18, 0  ;;  %v158_v32 = vcvt.s32.f32 %v151_v3  ;;  %v273_v36 = vsub.s32 4, %v777_v22 }
  0xc1   :  { %v258_v33 = vsel %vm537_vm5, 0, %v536_v18  ;;  %v356_v38 = vadd.s32 1, %v833_v24  ;;  %v353_v61 = vmul.u32 %v761_v60, %v337_v29  ;;  %v846_v58 = vshrl.u32 %v421_v26, 5 }
  0xc2   :  { %v156_v31 = vand.u32 2147483647, %v155_v6  ;;  %v259_v34 = vsub.s32 32, %v258_v33  ;;  %v263_v35 = vsub.s32 4294967266, %v258_v33  ;;  %v424_v4 = vsub.s32 32, %v423_v30 }
  0xc3   :  { %v260_v59 = vshll.u32 %v793_v45, %v258_v33  ;;  %v357_v40 = vsel %vm355_vm6, %v356_v38, %v833_v24  ;;  %v426_v9 = vshll.u32 %v616_v11, %v423_v30  ;;  %v429_v54 = vshll.u32 %v617_v15, %v423_v30 }
  0xc4   :  { %v159_v44 = vmul.f32 %v158_v32, %v156_v31  ;;  %v261_v37 = vshrl.u32 %v243_v23, %v259_v34  ;;  %v264_v39 = vadd.s32 127, %v263_v35  ;;  %v358_v49 = vadd.s32 %v357_v40, %v353_v61 }
  0xc5   :  { %v427_v51 = vshrl.u32 %v617_v15, %v424_v4  ;;  %v430_v60 = vshrl.u32 %v618_v17, %v424_v4  ;;  %v432_v13 = vshll.u32 %v618_v17, %v423_v30  ;;  %v433_v53 = vshrl.u32 %v619_v19, %v424_v4 }
  0xc6   :  { %v160_v48 = vxor.u32 2147483648, %v159_v44  ;;  %v262_v52 = vor.u32 %v261_v37, %v260_v59  ;;  %v265_v46 = vshll.u32 %v264_v39, 23  ;;  %v359_v45 = vadd.s32 536870912, %v358_v49 }
  0xc7   :  { %v428_v7 = vor.u32 %v427_v51, %v426_v9  ;;  %v435_v63 = vshll.u32 %v619_v19, %v423_v30  ;;  %v436_v1 = vshrl.u32 %v620_v21, %v424_v4  ;;  %v431_v2 = vor.u32 %v430_v60, %v429_v54 }
  0xc8   :  { %v161_v55 = vsel %vm78_vm13, %v160_v48, %v159_v44  ;;  %v266_v57 = vor.u32 4788187, %v265_v46  ;;  %v269_v15 = vcvt.s32.f32 %v262_v52  ;;  %v862_v0 = vshrl.u32 %v359_v45, 30 }
  0xc9   :  { %v164_v8 = vsel %vm783_vm14, %v654_v41, %v161_v55  ;;  %v439_v17 = vshrl.u32 %v621_v28, %v424_v4  ;;  %v170_v3 = vand.u32 3, %v169_v27  ;;  %vm189_vm7 = vcmp.lt.s32.totalorder %v656_v42, 0 }
  0xca   :  { %575 = vcosq.f32 %v164_v8  ;;  %v267_v56 = vand.u32 2147483647, %v266_v57  ;;  %v361_v25 = vshll.u32 %v862_v0, 30  ;;  %v437_v10 = vor.u32 %v436_v1, %v435_v63 }
  0xcb   :  { %577 = vsinq.f32 %v164_v8  ;;  %vm870_vm8 = vcmp.le.f32.partialorder %v187_v47, 0.7853982  ;;  %v434_v18 = vor.u32 %v433_v53, %v432_v13  ;;  %v438_v24 = vshll.u32 %v620_v21, %v423_v30 }
  0xcc   :  { %v270_v12 = vmul.f32 %v269_v15, %v267_v56  ;;  %v274_v28 = vsel %vm189_vm7, %v273_v36, %v777_v22  ;;  %v878_v6 = vsub.s32 %v358_v49, %v361_v25  ;;  %vm441_vm9 = vcmp.lt.s32.totalorder %v846_v58, 1 }
  0xcd   :  { %v457_v23 = vshll.u32 %v417_v14, 8  ;;  %v440_v27 = vor.u32 %v439_v17, %v438_v24  ;;  %vm444_vm10 = vcmp.lt.s32.totalorder %v846_v58, 4  ;;  %v449_v47 = vsel %vm441_vm9, %v428_v7, %v431_v2 }
  0xce   :  { %v271_v26 = vxor.u32 2147483648, %v270_v12  ;;  %vm171_vm11 = vcmp.lt.s32.totalorder %v170_v3, 2  ;;  %v364_v29 = vsub.s32 0, %v878_v6  ;;  %v425_v21 = vshrl.u32 %v616_v11, %v424_v4 }
  0xcf   :  { %vm443_vm12 = vcmp.lt.s32.totalorder %v846_v58, 3  ;;  %v450_v22 = vsel %vm444_vm10, %v437_v10, 920167782  ;;  %vm442_vm13 = vcmp.lt.s32.totalorder %v846_v58, 2  ;;  %v446_v30 = vsel %vm444_vm10, %v434_v18, 2102212464 }
  0xd0   :  { %v272_v14 = vsel %vm189_vm7, %v271_v26, %v270_v12  ;;  %v451_v31 = vsel %vm443_vm12, %v434_v18, %v450_v22  ;;  %v539_v32 = vmin.u32 %v364_v29, %v878_v6  ;;  %v453_v34 = vsel %vm441_vm9, %v431_v2, %v434_v18 }
  0xd1   :  { %v275_v11 = vsel %vm870_vm8, %v656_v42, %v272_v14  ;;  %v452_v33 = vsel %vm442_vm13, %v449_v47, %v451_v31  ;;  %v454_v35 = vsel %vm444_vm10, %v440_v27, 1326507024  ;;  %vm172_vm14 = vcmp.eq.s32.totalorder %v170_v3, 0 }
  0xd2   :  { %579 = vcosq.f32 %v275_v11  ;;  %v906_v36 = vmul.u32.u64.low %v457_v23, %v452_v33  ;;  %v907_v38 = vmul.u32.u64.high %v457_v23, %v452_v33, %v906_v36  ;;  %v276_v61 = vsel %vm870_vm8, 0, %v274_v28 }
  0xd3   :  { %581 = vsinq.f32 %v275_v11  ;;  %v366_v4 = vclz %v539_v32  ;;  %v445_v39 = vsel %vm441_vm9, %v425_v21, %v428_v7  ;;  %v447_v40 = vsel %vm443_vm12, %v431_v2, %v446_v30 }
  0xd4   :  { %v576_v44 = vpop.eup %575  ;;  %v455_v48 = vsel %vm443_vm12, %v437_v10, %v454_v35  ;;  %vm175_vm15 = vcmp.eq.s32.totalorder %v170_v3, 2  ;;  %v280_v46 = vadd.s32 3, %v276_v61  ;;  %v448_v45 = vsel %vm442_vm13, %v445_v39, %v447_v40 }
  0xd5   :  { %v578_v59 = vpop.eup %577  ;;  %v176_v37 = vxor.u32 2147483648, %v576_v44  ;;  %v540_v9 = vadd.s32 4294967294, %v366_v4  ;;  %v456_v51 = vsel %vm442_vm13, %v453_v34, %v455_v48  ;;  %v467_v13 = vadd.s32 1, %v907_v38 }
  0xd6   :  { %v173_v49 = vxor.u32 2147483648, %v578_v59  ;;  %v920_v54 = vmul.u32.u64.low %v457_v23, %v456_v51  ;;  %v921_v60 = vmul.u32.u64.high %v457_v23, %v456_v51, %v920_v54  ;;  %vm168_vm1 = vweird.f32 %v654_v41 }
  0xd7   :  { %v177_v52 = vsel %vm175_vm15, %v176_v37, %v578_v59  ;;  %vm541_vm0 = vcmp.lt.s32.totalorder %v540_v9, 0  ;;  %v354_v7 = vadd.s32 %v832_v20, %v829_v16  ;;  %v281_v1 = vand.u32 3, %v280_v46 }
  0xd8   :  { %v174_v55 = vsel %vm172_vm14, %v576_v44, %v173_v49  ;;  %v369_v8 = vsel %vm541_vm0, 0, %v540_v9  ;;  %v464_v56 = vmul.u32 %v457_v23, %v448_v45  ;;  %vm466_vm2 = vc.u32 %v921_v60, %v906_v36 }
  0xd9   :  { %v178_v53 = vsel %vm171_vm11, %v174_v55, %v177_v52  ;;  %v370_v63 = vsub.s32 32, %v369_v8  ;;  %v374_v15 = vsub.s32 4294967266, %v369_v8  ;;  %v371_v58 = vshll.u32 %v878_v6, %v369_v8 }
  0xda   :  { %v179_v57 = vsel %vm168_vm1, nan, %v178_v53  ;;  %v468_v41 = vsel %vm466_vm2, %v467_v13, %v907_v38  ;;  %vm286_vm3 = vcmp.eq.s32.totalorder %v281_v1, 2  ;;  %vm283_vm4 = vcmp.eq.s32.totalorder %v281_v1, 0 }
  0xdb   :  { %180 = vst [vmem:[#allocation2] sm:$0xff] %v179_v57  ;;  %v372_v2 = vshrl.u32 %v354_v7, %v370_v63  ;;  %v375_v17 = vadd.s32 127, %v374_v15  ;;  %v469_v25 = vadd.s32 %v468_v41, %v464_v56  ;;  %vm282_vm5 = vcmp.lt.s32.totalorder %v281_v1, 2 }
  0xdc   :  { %v580_v3 = vpop.eup %579  ;;  %vm279_vm6 = vweird.f32 %v656_v42  ;;  %v384_v14 = vsub.s32 4, %v862_v0  ;;  %vm300_vm7 = vcmp.lt.s32.totalorder %v658_v43, 0  ;;  %vm299_vm8 = vcmp.le.f32.partialorder %v298_v62, 0.7853982 }
  0xdd   :  { %v582_v10 = vpop.eup %581  ;;  %v287_v19 = vxor.u32 2147483648, %v580_v3  ;;  %v373_v12 = vor.u32 %v372_v2, %v371_v58  ;;  %v376_v16 = vshll.u32 %v375_v17, 23  ;;  %v470_v18 = vadd.s32 536870912, %v469_v25 }
  0xde   :  { %v284_v20 = vxor.u32 2147483648, %v582_v10  ;;  %v385_v42 = vsel %vm300_vm7, %v384_v14, %v862_v0  ;;  %v465_v59 = vadd.s32 %v906_v36, %v921_v60  ;;  %vm390_vm13 = vweird.f32 %v658_v43 }
  0xdf   :  { %v288_v24 = vsel %vm286_vm3, %v287_v19, %v582_v10  ;;  %v377_v28 = vor.u32 4788187, %v376_v16  ;;  %v471_v26 = vshrl.u32 %v470_v18, 30  ;;  %v380_v47 = vcvt.s32.f32 %v373_v12 }
  0xe0   :  { %v285_v23 = vsel %vm283_vm4, %v580_v3, %v284_v20  ;;  %v387_v35 = vsel %vm299_vm8, 0, %v385_v42  ;;  %vm411_vm14 = vcmp.lt.s32.totalorder %v670_v5, 0  ;;  %vm410_vm15 = vcmp.le.f32.partialorder %v409_v50, 0.7853982 }
  0xe1   :  { %v289_v6 = vsel %vm282_vm5, %v285_v23, %v288_v24  ;;  %v378_v27 = vand.u32 2147483647, %v377_v28  ;;  %v472_v21 = vshll.u32 %v471_v26, 30  ;;  %v391_v61 = vadd.s32 3, %v387_v35 }
  0xe2   :  { %v290_v29 = vsel %vm279_vm6, nan, %v289_v6  ;;  %v495_v7 = vsub.s32 4, %v471_v26  ;;  %vm501_vm3 = vweird.f32 %v670_v5 }
  0xe3   :  { %291 = vst [vmem:[#allocation2 + $0x8] sm:$0xff] %v290_v29  ;;  %v381_v22 = vmul.f32 %v380_v47, %v378_v27  ;;  %v473_v30 = vsub.s32 %v469_v25, %v472_v21  ;;  %v392_v62 = vand.u32 3, %v391_v61 }
  0xe4   :  { %v496_v1 = vsel %vm411_vm14, %v495_v7, %v471_v26 }
  0xe5   :  { %v382_v31 = vxor.u32 2147483648, %v381_v22  ;;  %v475_v11 = vsub.s32 0, %v473_v30  ;;  %vm397_vm10 = vcmp.eq.s32.totalorder %v392_v62, 2  ;;  %vm394_vm11 = vcmp.eq.s32.totalorder %v392_v62, 0 }
  0xe6   :  { %vm393_vm12 = vcmp.lt.s32.totalorder %v392_v62, 2  ;;  %v498_v58 = vsel %vm410_vm15, 0, %v496_v1 }
  0xe7   :  { %v383_v32 = vsel %vm300_vm7, %v382_v31, %v381_v22  ;;  %v543_v34 = vmin.u32 %v475_v11, %v473_v30 }
  0xe8   :  { %v386_v33 = vsel %vm299_vm8, %v658_v43, %v383_v32  ;;  %v502_v43 = vadd.s32 3, %v498_v58 }
  0xe9   :  { %583 = vcosq.f32 %v386_v33  ;;  %v477_v38 = vclz %v543_v34 }
  0xea   :  { %585 = vsinq.f32 %v386_v33  ;;  %v503_v2 = vand.u32 3, %v502_v43 }
  0xeb   :  { %v544_v44 = vadd.s32 4294967294, %v477_v38 }
  0xec   :  { %vm508_vm0 = vcmp.eq.s32.totalorder %v503_v2, 2  ;;  %vm505_vm1 = vcmp.eq.s32.totalorder %v503_v2, 0  ;;  %vm504_vm2 = vcmp.lt.s32.totalorder %v503_v2, 2 }
  0xed   :  { %vm545_vm9 = vcmp.lt.s32.totalorder %v544_v44, 0 }
  0xee   :  { %v480_v4 = vsel %vm545_vm9, 0, %v544_v44 }
  0xef   :  { %v481_v37 = vsub.s32 32, %v480_v4  ;;  %v485_v39 = vsub.s32 4294967266, %v480_v4  ;;  %v482_v40 = vshll.u32 %v473_v30, %v480_v4 }
  0xf1   :  { %v483_v48 = vshrl.u32 %v465_v59, %v481_v37  ;;  %v486_v0 = vadd.s32 127, %v485_v39 }
  0xf3   :  { %v584_v49 = vpop.eup %583  ;;  %v484_v52 = vor.u32 %v483_v48, %v482_v40  ;;  %v487_v46 = vshll.u32 %v486_v0, 23 }
  0xf4   :  { %v586_v9 = vpop.eup %585  ;;  %v398_v51 = vxor.u32 2147483648, %v584_v49 }
  0xf5   :  { %v395_v54 = vxor.u32 2147483648, %v586_v9  ;;  %v488_v45 = vor.u32 4788187, %v487_v46  ;;  %v491_v53 = vcvt.s32.f32 %v484_v52 }
  0xf6   :  { %v399_v55 = vsel %vm397_vm10, %v398_v51, %v586_v9 }
  0xf7   :  { %v396_v13 = vsel %vm394_vm11, %v584_v49, %v395_v54  ;;  %v489_v60 = vand.u32 2147483647, %v488_v45 }
  0xf8   :  { %v400_v36 = vsel %vm393_vm12, %v396_v13, %v399_v55 }
  0xf9   :  { %v401_v8 = vsel %vm390_vm13, nan, %v400_v36  ;;  %v492_v57 = vmul.f32 %v491_v53, %v489_v60 }
  0xfa   :  { %402 = vst [vmem:[#allocation2 + $0x10] sm:$0xff] %v401_v8 }
  0xfb   :  { %v493_v63 = vxor.u32 2147483648, %v492_v57 }
  0xfd   :  { %v494_v15 = vsel %vm411_vm14, %v493_v63, %v492_v57 }
  0xfe   :  { %v497_v56 = vsel %vm410_vm15, %v670_v5, %v494_v15 }
  0xff   :  { %587 = vcosq.f32 %v497_v56 }
 0x100   :  { %589 = vsinq.f32 %v497_v56 }
 0x109   :  { %v588_v17 = vpop.eup %587 }
 0x10a   :  { %v590_v41 = vpop.eup %589  ;;  %v509_v3 = vxor.u32 2147483648, %v588_v17 }
 0x10b   :  { %v506_v25 = vxor.u32 2147483648, %v590_v41 }
 0x10c   :  { %v510_v10 = vsel %vm508_vm0, %v509_v3, %v590_v41 }
 0x10d   :  { %v507_v50 = vsel %vm505_vm1, %v588_v17, %v506_v25 }
 0x10e   :  { %v511_v19 = vsel %vm504_vm2, %v507_v50, %v510_v10 }
 0x10f   :  { %v512_v12 = vsel %vm501_vm3, nan, %v511_v19 }
 0x110   :  { %513 = vst [vmem:[#allocation2 + $0x18] sm:$0xff] %v512_v12 }
 0x111   :  { %602 = shalt.err (!%p599_p4)
}
 0x112   :  { %s603_s20 = scalar_lea.hbm %s965_s3, 512 }
 0x113   :  { %p604_p5 = scmp.ne.s32.totalorder %s965_s3, %s603_s20  ;;  %p607_p6 = scmp.lt.u32.totalorder %s603_s20, %s965_s3 }
 0x115   :  { %p609_p7 = pnand %p607_p6, %p604_p5 }
 0x117   :  { %612 = shalt.err (!%p609_p7)
}
 0x118   :  { %s623_s25 = smov 128   ;;  %s624_s26 = smov 8  }
 0x119   :  { %525 = dma.vmem_to_hbm [thread:$0]  %s520_s1, 512, %s965_s3, [#allocation3], %s623_s25, %s623_s25, %s624_s26  }
 0x11a   :  { %613 = dma.done.wait [#allocation3], 512  }
 0x11b   :  { %614 = vsyncadd [#allocation3], 4294966784 }
 0x11c   :  { %529 = vsyncpa [#allocation3], 1 }

</bundles_post_ra>
